<compile_context>
chip_gen: v5e
topology: v5e:2x2
jax: 0.10.0
libtpu: 0.0.40
codegen_flags: <defaults>
</compile_context>

<pallas_src>
import functools

import jax
import jax.numpy as jnp
from jax.experimental import pallas as pl
from jax.experimental.pallas import tpu as pltpu

_MAX_TILE_ROWS = 1024  # local rows per grid step at large B*L (bf16 block = 3*1024*256*2 B)


def _round_up(x, m):
    return (x + m - 1) // m * m


def deep_mi_loss_kernel(loc_ref, xg_ref, xgp_ref, cp_ref, w1g1_ref, wmid_ref, vec_ref,
                        out_ref, acc_ref, *, n_loc, n_glb, tile):
    """One grid step over `tile` local rows (+ the whole tiny global path).

    loc_ref : (3, tile, 256) bf16  [0]=x_local rows, [1]=x_local_prime rows, [2]=c rows
                                   (channel-last, padded with zero rows past n_loc)
    xg_ref / xgp_ref / cp_ref : (n_glb, 256) f32  x_global / x_global_prime / c_p
    w1g1_ref: (512, 256) bf16  rows 0:256 act on the c channels, 256:512 on the x channels;
                               cols 0:128 = local conv1^T, cols 128:256 = global c1^T
    wmid_ref: (192, 128) bf16  rows 0:128 = [local conv2^T | global c2^T] side by side,
                               rows 128:192 cols 0:32 = global c3^T
    vec_ref : (3, 128)   f32   row0[:64]=local conv3 w, row1[:32]=l0 w, row2[0]=l0 bias
    out_ref : (1, 1) f32       scalar loss (written on the last grid step)
    acc_ref : SMEM (1,) f32    running local softplus sum across grid steps
    """
    f32 = jnp.float32
    bf16 = jnp.bfloat16
    step = pl.program_id(0)
    n_steps = pl.num_programs(0)

    def relu(x):
        return jnp.maximum(x, 0.0)

    def softplus(x):  # numerically stable log(1 + exp(x)), f32
        return jnp.maximum(x, 0.0) + jnp.log(1.0 + jnp.exp(-jnp.abs(x)))

    def dot(a, b):
        return jnp.dot(a, b, preferred_element_type=f32)

    @pl.when(step == 0)
    def _():
        acc_ref[0] = 0.0

    # ---- packed weights (all slices tile-aligned) ----
    w1_c = w1g1_ref[0:256, :]        # (256, 256): cols 0:128 local (c half), 128:256 global (c_p half)
    w1_x = w1g1_ref[256:512, :]      # (256, 256): x halves
    w2g2 = wmid_ref[0:128, :]        # (128, 128): cols 0:64 local conv2, 64:128 global c2
    g3 = wmid_ref[128:192, 0:32]     # (64, 32)   global c3
    w3 = vec_ref[0:1, 0:64]          # (1, 64)    local conv3 (64 -> 1)
    l0w = vec_ref[1:2, 0:32]         # (1, 32)    Linear(32, 1) weight
    l0b = vec_ref[2:3, 0:1]          # (1, 1)     Linear(32, 1) bias

    # ---- gather rows: local tile (already bf16) + the 4-ish global rows (cast in kernel) ----
    loc = loc_ref[...]                                  # (3, T, 256) bf16
    x2 = loc[0:2].reshape(2 * tile, 256)                # [x_local tile ; x_local_prime tile]
    cc = loc[2]                                         # (T, 256)
    xg = xg_ref[...].astype(bf16)                       # (B, 256)
    xgp = xgp_ref[...].astype(bf16)
    cp = cp_ref[...].astype(bf16)

    x_rows = jnp.concatenate([x2, xg, xgp], axis=0)     # (2T + 2B, 256)
    c_rows = jnp.concatenate([cc, cp, cp], axis=0)      # (T + 2B, 256)

    # ---- layer 1: two lane-dense N=256 chains (local cols 0:128, global cols 128:256) ----
    x1 = dot(x_rows, w1_x)                              # (2T + 2B, 256) f32
    c1 = dot(c_rows, w1_c)                              # (T + 2B, 256)  f32

    # local: shared c projection broadcast over joint/marginal halves (no sublane concat)
    xl = x1[0:2 * tile, 0:128].reshape(2, tile, 128)
    cl = c1[0:tile, 0:128]
    h_loc = relu((xl + cl[None, :, :]).reshape(2 * tile, 128))      # (2T, 128)

    # global: rows already paired [x_g ; x_g'] with [c_p ; c_p]
    xgl = x1[2 * tile:2 * tile + 2 * n_glb, 128:256]
    cgl = c1[tile:tile + 2 * n_glb, 128:256]
    h_glb = relu(xgl + cgl)                                          # (2B, 128)

    # ---- layer 2: one merged (rows,128)@(128,128) chain; local out cols 0:64, global 64:128 ----
    h1 = jnp.concatenate([h_loc, h_glb], axis=0).astype(bf16)        # (2T + 2B, 128)
    h2 = relu(dot(h1, w2g2))                                         # (2T + 2B, 128) f32

    # ---- local scores: conv3 (64->1, no bias) + relu, VPU mul + lane reduce ----
    s_loc = relu(jnp.sum(h2[0:2 * tile, 0:64] * w3, axis=-1, keepdims=True))   # (2T, 1)

    # ---- local softplus partial sum: sign trick + pad-row mask ----
    row = jax.lax.broadcasted_iota(jnp.int32, (2 * tile, 1), 0)
    row_in = jnp.where(row < tile, row, row - tile)       # position within joint/marginal half
    signed = jnp.where(row < tile, -s_loc, s_loc)         # joint -> -s, marginal -> +s
    valid = (step * tile + row_in) < n_loc                # mask zero-pad rows
    acc_ref[0] += jnp.sum(jnp.where(valid, softplus(signed), 0.0))

    # ---- global tail + final scalar, once on the last step ----
    @pl.when(step == n_steps - 1)
    def _():
        hg = h2[2 * tile:2 * tile + 2 * n_glb, 64:128]               # (2B, 64)
        h3 = relu(dot(hg.astype(bf16), g3))                          # (2B, 32)
        s_glb = jnp.sum(h3 * l0w, axis=-1, keepdims=True) + l0b      # (2B, 1)
        rg = jax.lax.broadcasted_iota(jnp.int32, (2 * n_glb, 1), 0)
        glb_sum = jnp.sum(softplus(jnp.where(rg < n_glb, -s_glb, s_glb)))
        loss = acc_ref[0] * (0.5 / n_loc) + glb_sum * (0.5 / n_glb)
        out_ref[...] = jnp.reshape(loss, (1, 1)).astype(jnp.float32)


def _deep_mi_loss(x_global, x_global_prime, x_local, x_local_prime, c, c_p, packed_params,
                  *, tile_rows=None):
    """Wrapper: a single stack/transpose/reshape(+pad)/bf16 fusion for the local tensors;
    global tensors and weight slabs go to the kernel untouched."""
    B, C, L = x_local.shape
    assert C == 256, "DeepMILoss fixes the feature dim at 256"
    w1g1, wmid, vec = packed_params
    n_loc = B * L
    n_glb = B

    if tile_rows is None:
        tile = min(_MAX_TILE_ROWS, _round_up(n_loc, 16))
    else:
        tile = _round_up(int(tile_rows), 16)
    n_pad = _round_up(n_loc, tile)
    grid = n_pad // tile

    # All local NCL tensors -> ONE fusion: stack + transpose + reshape (+ pad) + bf16 cast.
    loc = jnp.stack([x_local, x_local_prime, c], axis=0)            # (3, B, C, L)
    loc = jnp.transpose(loc, (0, 1, 3, 2)).reshape(3, n_loc, C)     # channel-last rows
    if n_pad != n_loc:
        loc = jnp.pad(loc, ((0, 0), (0, n_pad - n_loc), (0, 0)))
    loc = loc.astype(jnp.bfloat16)

    kernel = functools.partial(deep_mi_loss_kernel, n_loc=n_loc, n_glb=n_glb, tile=tile)

    rows_x = 2 * n_pad + 2 * n_glb * grid
    rows_c = n_pad + 2 * n_glb * grid
    cost = pl.CostEstimate(
        flops=(2 * 256 * 256 * (rows_x + rows_c)      # layer 1 (two N=256 chains)
               + 2 * 128 * 128 * rows_x               # layer 2 (one N=128 chain)
               + 2 * 64 * 32 * 2 * n_glb              # global layer 3
               + 2 * 64 * 2 * n_pad + 2 * 32 * 2 * n_glb),
        transcendentals=2 * (2 * n_pad + 2 * n_glb),
        bytes_accessed=(3 * n_pad * C * 2 + 3 * n_glb * C * 4
                        + 512 * 256 * 2 + 192 * 128 * 2 + 3 * 128 * 4 + 4),
    )

    out = pl.pallas_call(
        kernel,
        out_shape=jax.ShapeDtypeStruct((1, 1), jnp.float32),
        grid_spec=pltpu.PrefetchScalarGridSpec(
            num_scalar_prefetch=0,
            grid=(grid,),
            in_specs=[
                pl.BlockSpec((3, tile, C), lambda i: (0, i, 0)),     # local row tiles
                pl.BlockSpec((n_glb, C), lambda i: (0, 0)),          # x_global   (resident)
                pl.BlockSpec((n_glb, C), lambda i: (0, 0)),          # x_global'  (resident)
                pl.BlockSpec((n_glb, C), lambda i: (0, 0)),          # c_p        (resident)
                pl.BlockSpec((512, 256), lambda i: (0, 0)),          # w1 | g1    (resident)
                pl.BlockSpec((192, 128), lambda i: (0, 0)),          # w2|g2, g3  (resident)
                pl.BlockSpec((3, 128), lambda i: (0, 0)),            # w3, l0     (resident)
            ],
            out_specs=pl.BlockSpec((1, 1), lambda i: (0, 0)),
            scratch_shapes=[pltpu.SMEM((1,), jnp.float32)],
        ),
        compiler_params=pltpu.CompilerParams(dimension_semantics=("arbitrary",)),
        cost_estimate=cost,
    )(loc, x_global, x_global_prime, c_p, w1g1, wmid, vec)
    return out[0, 0]


deep_mi_loss = jax.jit(_deep_mi_loss, static_argnames=("tile_rows",))


def init_params(key):
    """Synthetic weights, shapes from the module __init__.
    Conv1d(Cin, Cout, k=1, bias=False) weight (Cout, Cin, 1) stored transposed as (Cin, Cout)."""
    ks = jax.random.split(key, 8)
    scale = 0.05
    w1 = scale * jax.random.normal(ks[0], (512, 128), jnp.float32)   # local conv1
    w2 = scale * jax.random.normal(ks[1], (128, 64), jnp.float32)    # local conv2
    w3 = scale * jax.random.normal(ks[2], (1, 64), jnp.float32)      # local conv3 (64 -> 1)
    g1 = scale * jax.random.normal(ks[3], (512, 128), jnp.float32)   # global c1
    g2 = scale * jax.random.normal(ks[4], (128, 64), jnp.float32)    # global c2
    g3 = scale * jax.random.normal(ks[5], (64, 32), jnp.float32)     # global c3
    l0w = scale * jax.random.normal(ks[6], (1, 32), jnp.float32)     # Linear(32, 1) weight
    l0b = scale * jax.random.normal(ks[7], (1, 1), jnp.float32)      # Linear(32, 1) bias
    return (w1, w2, w3, g1, g2, g3, l0w, l0b)


def pack_params(params):
    """Pack the 8 raw weights into 3 kernel slabs (once, outside the hot path).
    Matmul weights are bf16 (MXU operands); the tiny projection/bias vector stays f32."""
    w1, w2, w3, g1, g2, g3, l0w, l0b = params
    w1g1 = jnp.concatenate([w1, g1], axis=1).astype(jnp.bfloat16)            # (512, 256)
    w2g2 = jnp.concatenate([w2, g2], axis=1)                                 # (128, 128)
    g3_pad = jnp.pad(g3, ((0, 0), (0, 96)))                                  # (64, 128)
    wmid = jnp.concatenate([w2g2, g3_pad], axis=0).astype(jnp.bfloat16)      # (192, 128)
    vec = jnp.zeros((3, 128), jnp.float32)
    vec = vec.at[0, :64].set(w3[0])
    vec = vec.at[1, :32].set(l0w[0])
    vec = vec.at[2, 0].set(l0b[0, 0])
    return (w1g1, wmid, vec)


def reference_loss(x_global, x_global_prime, x_local, x_local_prime, c, c_p, params):
    """Pure-JAX f32 reference mirroring the PyTorch forward (sanity check)."""
    w1, w2, w3, g1, g2, g3, l0w, l0b = params
    sp = jax.nn.softplus
    relu = jax.nn.relu
    B, C, L = x_local.shape

    def local_d(x_loc):
        xx = jnp.concatenate([c, x_loc], axis=1)                         # (B, 512, L)
        h = jnp.transpose(xx, (0, 2, 1)).reshape(B * L, 2 * C)
        h = relu(h @ w1)
        h = relu(h @ w2)
        s = relu(jnp.sum(h * w3, axis=-1, keepdims=True))
        return s.reshape(B, L)

    def global_d(x_glob):
        xx = jnp.concatenate([c_p, x_glob], axis=1)                      # (B, 512)
        h = relu(xx @ g1)
        h = relu(h @ g2)
        h = relu(h @ g3)
        return jnp.sum(h * l0w, axis=-1, keepdims=True) + l0b            # (B, 1)

    ej = -jnp.mean(sp(-local_d(x_local)))
    em = jnp.mean(sp(local_d(x_local_prime)))
    LOCAL = (em - ej) * 0.5
    ej = -jnp.mean(sp(-global_d(x_global)))
    em = jnp.mean(sp(global_d(x_global_prime)))
    GLOBAL = (em - ej) * 0.5
    return LOCAL + GLOBAL


def _make_inputs(key, B, C, L):
    k = jax.random.split(key, 6)
    x_global = jax.random.normal(k[0], (B, C), jnp.float32)
    x_global_prime = jax.random.normal(k[1], (B, C), jnp.float32)
    x_local = jax.random.normal(k[2], (B, C, L), jnp.float32)
    x_local_prime = jax.random.normal(k[3], (B, C, L), jnp.float32)
    c = jax.random.normal(k[4], (B, C, L), jnp.float32)
    c_p = jax.random.normal(k[5], (B, C), jnp.float32)
    return x_global, x_global_prime, x_local, x_local_prime, c, c_p


if __name__ == "__main__":
    B, C, L = 2, 256, 8   # channel dim fixed at 256 by the module definition

    key = jax.random.PRNGKey(0)
    k_in, k_par, k_in2 = jax.random.split(key, 3)
    inputs = _make_inputs(k_in, B, C, L)
    params = init_params(k_par)
    packed = pack_params(params)

    # Check 1: toy shape, single-step grid.
    loss = deep_mi_loss(*inputs, packed)
    loss = jax.block_until_ready(loss)
    ref = reference_loss(*inputs, params)
    ref = jax.block_until_ready(ref)
    # Tolerance loosened vs. all-f32 because MXU operands are bf16 (f32 accumulation).
    assert jnp.allclose(loss, ref, atol=2e-2, rtol=2e-2), (loss, ref)

    # Check 2: exercise the multi-step grid + pad-row masking (n_loc=26 -> 2 tiles of 16, 6 pad rows).
    inputs2 = _make_inputs(k_in2, B, C, 13)
    loss2 = deep_mi_loss(*inputs2, packed, tile_rows=16)
    loss2 = jax.block_until_ready(loss2)
    ref2 = reference_loss(*inputs2, params)
    ref2 = jax.block_until_ready(ref2)
    assert jnp.allclose(loss2, ref2, atol=2e-2, rtol=2e-2), (loss2, ref2)

    print("KERNEL_OK")
</pallas_src>

<mosaic_0001>
module attributes {stable_mosaic.version = 11 : i64} {
  func.func @deep_mi_loss_kernel(%arg0: i32, %arg1: memref<3x16x256xbf16, #tpu.memory_space<vmem>>, %arg2: memref<2x256xf32, #tpu.memory_space<vmem>>, %arg3: memref<2x256xf32, #tpu.memory_space<vmem>>, %arg4: memref<2x256xf32, #tpu.memory_space<vmem>>, %arg5: memref<512x256xbf16, #tpu.memory_space<vmem>>, %arg6: memref<192x128xbf16, #tpu.memory_space<vmem>>, %arg7: memref<3x128xf32, #tpu.memory_space<vmem>>, %arg8: memref<1x1xf32, #tpu.memory_space<vmem>>, %arg9: memref<1xf32, #tpu.memory_space<smem>>) attributes {dimension_semantics = [#tpu.dimension_semantics<arbitrary>], iteration_bounds = array<i64: 1>, scalar_prefetch = 0 : i64, scratch_operands = 1 : i64, tpu.core_type = #tpu.core_type<tc>, window_params = [{transform_indices = @transform_0, window_bounds = array<i64: 3, 16, 256>}, {pipeline_mode = #tpu.pipeline_mode<synchronous>, transform_indices = @transform_1, window_bounds = array<i64: 2, 256>}, {pipeline_mode = #tpu.pipeline_mode<synchronous>, transform_indices = @transform_2, window_bounds = array<i64: 2, 256>}, {pipeline_mode = #tpu.pipeline_mode<synchronous>, transform_indices = @transform_3, window_bounds = array<i64: 2, 256>}, {pipeline_mode = #tpu.pipeline_mode<synchronous>, transform_indices = @transform_4, window_bounds = array<i64: 512, 256>}, {pipeline_mode = #tpu.pipeline_mode<synchronous>, transform_indices = @transform_5, window_bounds = array<i64: 192, 128>}, {pipeline_mode = #tpu.pipeline_mode<synchronous>, transform_indices = @transform_6, window_bounds = array<i64: 3, 128>}, {pipeline_mode = #tpu.pipeline_mode<synchronous>, transform_indices = @transform_7, window_bounds = array<i64: 1, 1>}]} {
    %c0_i32 = arith.constant 0 : i32
    %0 = arith.cmpi eq, %arg0, %c0_i32 : i32
    %1 = arith.extui %0 : i1 to i32
    %c0_i32_0 = arith.constant 0 : i32
    %2 = arith.cmpi ne, %1, %c0_i32_0 : i32
    scf.if %2 {
      %cst_40 = arith.constant 0.000000e+00 : f32
      %c0_41 = arith.constant 0 : index
      %89 = memref.load %arg9[%c0_41] : memref<1xf32, #tpu.memory_space<smem>>
      memref.store %cst_40, %arg9[%c0_41] : memref<1xf32, #tpu.memory_space<smem>>
    } else {
    }
    %c0 = arith.constant 0 : index
    %c0_1 = arith.constant 0 : index
    %3 = vector.load %arg5[%c0, %c0_1] : memref<512x256xbf16, #tpu.memory_space<vmem>>, vector<256x256xbf16>
    %c256 = arith.constant 256 : index
    %c0_2 = arith.constant 0 : index
    %4 = vector.load %arg5[%c256, %c0_2] : memref<512x256xbf16, #tpu.memory_space<vmem>>, vector<256x256xbf16>
    %c0_3 = arith.constant 0 : index
    %c0_4 = arith.constant 0 : index
    %5 = vector.load %arg6[%c0_3, %c0_4] : memref<192x128xbf16, #tpu.memory_space<vmem>>, vector<128x128xbf16>
    %c128 = arith.constant 128 : index
    %c0_5 = arith.constant 0 : index
    %6 = vector.load %arg6[%c128, %c0_5] : memref<192x128xbf16, #tpu.memory_space<vmem>>, vector<64x32xbf16>
    %c0_6 = arith.constant 0 : index
    %c0_7 = arith.constant 0 : index
    %7 = vector.load %arg7[%c0_6, %c0_7] : memref<3x128xf32, #tpu.memory_space<vmem>>, vector<1x64xf32>
    %c1 = arith.constant 1 : index
    %c0_8 = arith.constant 0 : index
    %8 = vector.load %arg7[%c1, %c0_8] : memref<3x128xf32, #tpu.memory_space<vmem>>, vector<1x32xf32>
    %c2 = arith.constant 2 : index
    %c0_9 = arith.constant 0 : index
    %9 = vector.load %arg7[%c2, %c0_9] : memref<3x128xf32, #tpu.memory_space<vmem>>, vector<1x1xf32>
    %c0_10 = arith.constant 0 : index
    %c0_11 = arith.constant 0 : index
    %c0_12 = arith.constant 0 : index
    %10 = vector.load %arg1[%c0_10, %c0_11, %c0_12] : memref<3x16x256xbf16, #tpu.memory_space<vmem>>, vector<3x16x256xbf16>
    %11 = vector.extract_strided_slice %10 {offsets = [0, 0, 0], sizes = [2, 16, 256], strides = [1, 1, 1]} : vector<3x16x256xbf16> to vector<2x16x256xbf16>
    %12 = vector.shape_cast %11 : vector<2x16x256xbf16> to vector<32x256xbf16>
    %13 = vector.extract_strided_slice %10 {offsets = [2, 0, 0], sizes = [1, 16, 256], strides = [1, 1, 1]} : vector<3x16x256xbf16> to vector<1x16x256xbf16>
    %14 = vector.shape_cast %13 : vector<1x16x256xbf16> to vector<16x256xbf16>
    %c0_13 = arith.constant 0 : index
    %c0_14 = arith.constant 0 : index
    %15 = vector.load %arg2[%c0_13, %c0_14] : memref<2x256xf32, #tpu.memory_space<vmem>>, vector<2x256xf32>
    %16 = arith.truncf %15 : vector<2x256xf32> to vector<2x256xbf16>
    %c0_15 = arith.constant 0 : index
    %c0_16 = arith.constant 0 : index
    %17 = vector.load %arg3[%c0_15, %c0_16] : memref<2x256xf32, #tpu.memory_space<vmem>>, vector<2x256xf32>
    %18 = arith.truncf %17 : vector<2x256xf32> to vector<2x256xbf16>
    %c0_17 = arith.constant 0 : index
    %c0_18 = arith.constant 0 : index
    %19 = vector.load %arg4[%c0_17, %c0_18] : memref<2x256xf32, #tpu.memory_space<vmem>>, vector<2x256xf32>
    %20 = arith.truncf %19 : vector<2x256xf32> to vector<2x256xbf16>
    %21 = tpu.concatenate %12, %16, %18 in 0 : vector<32x256xbf16>, vector<2x256xbf16>, vector<2x256xbf16> -> vector<36x256xbf16>
    %22 = tpu.concatenate %14, %20, %20 in 0 : vector<16x256xbf16>, vector<2x256xbf16>, vector<2x256xbf16> -> vector<20x256xbf16>
    %cst = arith.constant dense<0.000000e+00> : vector<36x256xf32>
    %23 = tpu.matmul %21, %4, %cst {dimension_numbers = #tpu.dot_dimension_numbers<[1], [0], [0], [1], [0, 0, 1, 1], [], []>} : vector<36x256xbf16>, vector<256x256xbf16>, vector<36x256xf32> -> vector<36x256xf32>
    %cst_19 = arith.constant dense<0.000000e+00> : vector<20x256xf32>
    %24 = tpu.matmul %22, %3, %cst_19 {dimension_numbers = #tpu.dot_dimension_numbers<[1], [0], [0], [1], [0, 0, 1, 1], [], []>} : vector<20x256xbf16>, vector<256x256xbf16>, vector<20x256xf32> -> vector<20x256xf32>
    %25 = vector.extract_strided_slice %23 {offsets = [0, 0], sizes = [32, 128], strides = [1, 1]} : vector<36x256xf32> to vector<32x128xf32>
    %26 = vector.shape_cast %25 : vector<32x128xf32> to vector<2x16x128xf32>
    %27 = vector.extract_strided_slice %24 {offsets = [0, 0], sizes = [16, 128], strides = [1, 1]} : vector<20x256xf32> to vector<16x128xf32>
    %28 = vector.shape_cast %27 : vector<16x128xf32> to vector<1x16x128xf32>
    %29 = vector.broadcast %28 : vector<1x16x128xf32> to vector<2x16x128xf32>
    %30 = arith.addf %26, %29 : vector<2x16x128xf32>
    %31 = vector.shape_cast %30 : vector<2x16x128xf32> to vector<32x128xf32>
    %cst_20 = arith.constant 0.000000e+00 : f32
    %32 = vector.broadcast %cst_20 : f32 to vector<32x128xf32>
    %33 = arith.maximumf %31, %32 : vector<32x128xf32>
    %34 = vector.extract_strided_slice %23 {offsets = [32, 128], sizes = [4, 128], strides = [1, 1]} : vector<36x256xf32> to vector<4x128xf32>
    %35 = vector.extract_strided_slice %24 {offsets = [16, 128], sizes = [4, 128], strides = [1, 1]} : vector<20x256xf32> to vector<4x128xf32>
    %36 = arith.addf %34, %35 : vector<4x128xf32>
    %cst_21 = arith.constant 0.000000e+00 : f32
    %37 = vector.broadcast %cst_21 : f32 to vector<4x128xf32>
    %38 = arith.maximumf %36, %37 : vector<4x128xf32>
    %39 = tpu.concatenate %33, %38 in 0 : vector<32x128xf32>, vector<4x128xf32> -> vector<36x128xf32>
    %40 = arith.truncf %39 : vector<36x128xf32> to vector<36x128xbf16>
    %cst_22 = arith.constant dense<0.000000e+00> : vector<36x128xf32>
    %41 = tpu.matmul %40, %5, %cst_22 {dimension_numbers = #tpu.dot_dimension_numbers<[1], [0], [0], [1], [0, 0, 1, 1], [], []>} : vector<36x128xbf16>, vector<128x128xbf16>, vector<36x128xf32> -> vector<36x128xf32>
    %cst_23 = arith.constant 0.000000e+00 : f32
    %42 = vector.broadcast %cst_23 : f32 to vector<36x128xf32>
    %43 = arith.maximumf %41, %42 : vector<36x128xf32>
    %44 = vector.extract_strided_slice %43 {offsets = [0, 0], sizes = [32, 64], strides = [1, 1]} : vector<36x128xf32> to vector<32x64xf32>
    %45 = vector.broadcast %7 : vector<1x64xf32> to vector<32x64xf32>
    %46 = arith.mulf %44, %45 : vector<32x64xf32>
    %cst_24 = arith.constant dense<0.000000e+00> : vector<32xf32>
    %47 = vector.multi_reduction <add>, %46, %cst_24 [1] : vector<32x64xf32> to vector<32xf32>
    %48 = vector.shape_cast %47 : vector<32xf32> to vector<32x1xf32>
    %cst_25 = arith.constant 0.000000e+00 : f32
    %49 = vector.broadcast %cst_25 : f32 to vector<32x1xf32>
    %50 = arith.maximumf %48, %49 : vector<32x1xf32>
    %51 = tpu.iota {dimensions = array<i32: 0>} : vector<32x1xi32>
    %c16_i32 = arith.constant 16 : i32
    %52 = vector.broadcast %c16_i32 : i32 to vector<32x1xi32>
    %53 = arith.cmpi slt, %51, %52 : vector<32x1xi32>
    %c16_i32_26 = arith.constant 16 : i32
    %54 = vector.broadcast %c16_i32_26 : i32 to vector<32x1xi32>
    %55 = arith.subi %51, %54 : vector<32x1xi32>
    %56 = arith.select %53, %51, %55 : vector<32x1xi1>, vector<32x1xi32>
    %c16_i32_27 = arith.constant 16 : i32
    %57 = vector.broadcast %c16_i32_27 : i32 to vector<32x1xi32>
    %58 = arith.cmpi slt, %51, %57 : vector<32x1xi32>
    %cst_28 = arith.constant 0.000000e+00 : f32
    %59 = vector.broadcast %cst_28 : f32 to vector<32x1xf32>
    %60 = arith.subf %59, %50 : vector<32x1xf32>
    %61 = arith.select %58, %60, %50 : vector<32x1xi1>, vector<32x1xf32>
    %c16_i32_29 = arith.constant 16 : i32
    %62 = arith.muli %arg0, %c16_i32_29 : i32
    %63 = vector.broadcast %62 : i32 to vector<32x1xi32>
    %64 = arith.addi %63, %56 : vector<32x1xi32>
    %c16_i32_30 = arith.constant 16 : i32
    %65 = vector.broadcast %c16_i32_30 : i32 to vector<32x1xi32>
    %66 = arith.cmpi slt, %64, %65 : vector<32x1xi32>
    %c0_31 = arith.constant 0 : index
    %67 = memref.load %arg9[%c0_31] : memref<1xf32, #tpu.memory_space<smem>>
    %cst_32 = arith.constant 0.000000e+00 : f32
    %68 = vector.broadcast %cst_32 : f32 to vector<32x1xf32>
    %69 = arith.maximumf %61, %68 : vector<32x1xf32>
    %70 = math.absf %61 : vector<32x1xf32>
    %cst_33 = arith.constant 0.000000e+00 : f32
    %71 = vector.broadcast %cst_33 : f32 to vector<32x1xf32>
    %72 = arith.subf %71, %70 : vector<32x1xf32>
    %73 = math.exp %72 : vector<32x1xf32>
    %cst_34 = arith.constant 1.000000e+00 : f32
    %74 = vector.broadcast %cst_34 : f32 to vector<32x1xf32>
    %75 = arith.addf %74, %73 : vector<32x1xf32>
    %76 = math.log %75 : vector<32x1xf32>
    %77 = arith.addf %69, %76 : vector<32x1xf32>
    %cst_35 = arith.constant 0.000000e+00 : f32
    %78 = vector.broadcast %cst_35 : f32 to vector<32x1xf32>
    %79 = arith.select %66, %77, %78 : vector<32x1xi1>, vector<32x1xf32>
    %80 = vector.shape_cast %79 : vector<32x1xf32> to vector<1x32x1xf32>
    %cst_36 = arith.constant dense<0.000000e+00> : vector<1xf32>
    %81 = vector.multi_reduction <add>, %80, %cst_36 [1, 2] : vector<1x32x1xf32> to vector<1xf32>
    %82 = vector.shape_cast %81 : vector<1xf32> to vector<1x1x1xf32>
    %83 = vector.extract %82[0, 0, 0] : f32 from vector<1x1x1xf32>
    %84 = arith.addf %67, %83 : f32
    %c0_37 = arith.constant 0 : index
    %85 = memref.load %arg9[%c0_37] : memref<1xf32, #tpu.memory_space<smem>>
    memref.store %84, %arg9[%c0_37] : memref<1xf32, #tpu.memory_space<smem>>
    %c0_i32_38 = arith.constant 0 : i32
    %86 = arith.cmpi eq, %arg0, %c0_i32_38 : i32
    %87 = arith.extui %86 : i1 to i32
    %c0_i32_39 = arith.constant 0 : i32
    %88 = arith.cmpi ne, %87, %c0_i32_39 : i32
    scf.if %88 {
      %89 = vector.extract_strided_slice %43 {offsets = [32, 64], sizes = [4, 64], strides = [1, 1]} : vector<36x128xf32> to vector<4x64xf32>
      %90 = arith.truncf %89 : vector<4x64xf32> to vector<4x64xbf16>
      %cst_40 = arith.constant dense<0.000000e+00> : vector<4x32xf32>
      %91 = tpu.matmul %90, %6, %cst_40 {dimension_numbers = #tpu.dot_dimension_numbers<[1], [0], [0], [1], [0, 0, 1, 1], [], []>} : vector<4x64xbf16>, vector<64x32xbf16>, vector<4x32xf32> -> vector<4x32xf32>
      %cst_41 = arith.constant 0.000000e+00 : f32
      %92 = vector.broadcast %cst_41 : f32 to vector<4x32xf32>
      %93 = arith.maximumf %91, %92 : vector<4x32xf32>
      %94 = vector.broadcast %8 : vector<1x32xf32> to vector<4x32xf32>
      %95 = arith.mulf %93, %94 : vector<4x32xf32>
      %cst_42 = arith.constant dense<0.000000e+00> : vector<4xf32>
      %96 = vector.multi_reduction <add>, %95, %cst_42 [1] : vector<4x32xf32> to vector<4xf32>
      %97 = vector.shape_cast %96 : vector<4xf32> to vector<4x1xf32>
      %98 = vector.broadcast %9 : vector<1x1xf32> to vector<4x1xf32>
      %99 = arith.addf %97, %98 : vector<4x1xf32>
      %100 = tpu.iota {dimensions = array<i32: 0>} : vector<4x1xi32>
      %c2_i32 = arith.constant 2 : i32
      %101 = vector.broadcast %c2_i32 : i32 to vector<4x1xi32>
      %102 = arith.cmpi slt, %100, %101 : vector<4x1xi32>
      %cst_43 = arith.constant 0.000000e+00 : f32
      %103 = vector.broadcast %cst_43 : f32 to vector<4x1xf32>
      %104 = arith.subf %103, %99 : vector<4x1xf32>
      %105 = arith.select %102, %104, %99 : vector<4x1xi1>, vector<4x1xf32>
      %cst_44 = arith.constant 0.000000e+00 : f32
      %106 = vector.broadcast %cst_44 : f32 to vector<4x1xf32>
      %107 = arith.maximumf %105, %106 : vector<4x1xf32>
      %108 = math.absf %105 : vector<4x1xf32>
      %cst_45 = arith.constant 0.000000e+00 : f32
      %109 = vector.broadcast %cst_45 : f32 to vector<4x1xf32>
      %110 = arith.subf %109, %108 : vector<4x1xf32>
      %111 = math.exp %110 : vector<4x1xf32>
      %cst_46 = arith.constant 1.000000e+00 : f32
      %112 = vector.broadcast %cst_46 : f32 to vector<4x1xf32>
      %113 = arith.addf %112, %111 : vector<4x1xf32>
      %114 = math.log %113 : vector<4x1xf32>
      %115 = arith.addf %107, %114 : vector<4x1xf32>
      %116 = vector.shape_cast %115 : vector<4x1xf32> to vector<1x4x1xf32>
      %cst_47 = arith.constant dense<0.000000e+00> : vector<1xf32>
      %117 = vector.multi_reduction <add>, %116, %cst_47 [1, 2] : vector<1x4x1xf32> to vector<1xf32>
      %118 = vector.shape_cast %117 : vector<1xf32> to vector<1x1x1xf32>
      %119 = vector.extract %118[0, 0, 0] : f32 from vector<1x1x1xf32>
      %c0_48 = arith.constant 0 : index
      %120 = memref.load %arg9[%c0_48] : memref<1xf32, #tpu.memory_space<smem>>
      %cst_49 = arith.constant 3.125000e-02 : f32
      %121 = arith.mulf %120, %cst_49 : f32
      %cst_50 = arith.constant 2.500000e-01 : f32
      %122 = arith.mulf %119, %cst_50 : f32
      %123 = arith.addf %121, %122 : f32
      %124 = vector.broadcast %123 : f32 to vector<1x1xf32>
      %c0_51 = arith.constant 0 : index
      %c0_52 = arith.constant 0 : index
      %125 = vector.load %arg8[%c0_51, %c0_52] : memref<1x1xf32, #tpu.memory_space<vmem>>, vector<1x1xf32>
      tpu.vector_store %arg8[%c0_51, %c0_52], %124 {strides = array<i32>} : memref<1x1xf32, #tpu.memory_space<vmem>>, vector<1x1xf32>,
    } else {
    }
    return
  }
  func.func @transform_0(%arg0: i32) -> (i32, i32, i32) {
    %c0_i32 = arith.constant 0 : i32
    %c0_i32_0 = arith.constant 0 : i32
    %c0_i32_1 = arith.constant 0 : i32
    return %c0_i32, %arg0, %c0_i32_0 : i32, i32, i32
  }
  func.func @transform_1(%arg0: i32) -> (i32, i32) {
    %c0_i32 = arith.constant 0 : i32
    %c0_i32_0 = arith.constant 0 : i32
    %c0_i32_1 = arith.constant 0 : i32
    return %c0_i32, %c0_i32_0 : i32, i32
  }
  func.func @transform_2(%arg0: i32) -> (i32, i32) {
    %c0_i32 = arith.constant 0 : i32
    %c0_i32_0 = arith.constant 0 : i32
    %c0_i32_1 = arith.constant 0 : i32
    return %c0_i32, %c0_i32_0 : i32, i32
  }
  func.func @transform_3(%arg0: i32) -> (i32, i32) {
    %c0_i32 = arith.constant 0 : i32
    %c0_i32_0 = arith.constant 0 : i32
    %c0_i32_1 = arith.constant 0 : i32
    return %c0_i32, %c0_i32_0 : i32, i32
  }
  func.func @transform_4(%arg0: i32) -> (i32, i32) {
    %c0_i32 = arith.constant 0 : i32
    %c0_i32_0 = arith.constant 0 : i32
    %c0_i32_1 = arith.constant 0 : i32
    return %c0_i32, %c0_i32_0 : i32, i32
  }
  func.func @transform_5(%arg0: i32) -> (i32, i32) {
    %c0_i32 = arith.constant 0 : i32
    %c0_i32_0 = arith.constant 0 : i32
    %c0_i32_1 = arith.constant 0 : i32
    return %c0_i32, %c0_i32_0 : i32, i32
  }
  func.func @transform_6(%arg0: i32) -> (i32, i32) {
    %c0_i32 = arith.constant 0 : i32
    %c0_i32_0 = arith.constant 0 : i32
    %c0_i32_1 = arith.constant 0 : i32
    return %c0_i32, %c0_i32_0 : i32, i32
  }
  func.func @transform_7(%arg0: i32) -> (i32, i32) {
    %c0_i32 = arith.constant 0 : i32
    %c0_i32_0 = arith.constant 0 : i32
    %c0_i32_1 = arith.constant 0 : i32
    return %c0_i32, %c0_i32_0 : i32, i32
  }
}

</mosaic_0001>

<bundles_post_ra>
// kernel: _deep_mi_loss.1
= control target key start
LH: loop header
LB: loop body
LE: loop exit
PB: predicated region body
PF: predicated region fallthrough
CT: control target
= control target key end

     0   :  { %12 = vsyncpa [#allocation4], 0  ;;  %s1698_s0 = inlined_call_operand.vmem [shape: bf16[3,16,256], index: 0, kind: input, shape index: {}]   ;;  %s1699_s1 = inlined_call_operand.vmem [shape: f32[2,256], index: 1, kind: input, shape index: {}]   ;;  %s1700_s2 = inlined_call_operand.vmem [shape: f32[2,256], index: 2, kind: input, shape index: {}]   ;;  %s1701_s3 = inlined_call_operand.vmem [shape: f32[2,256], index: 3, kind: input, shape index: {}]   ;;  %s1702_s4 = inlined_call_operand.hbm [shape: bf16[512,256], index: 4, kind: input, shape index: {}]   ;;  %s1703_s5 = inlined_call_operand.vmem [shape: bf16[192,128], index: 5, kind: input, shape index: {}]   ;;  %s1704_s6 = inlined_call_operand.vmem [shape: f32[3,128], index: 6, kind: input, shape index: {}]   ;;  %s1705_s7 = inlined_call_operand.hbm [shape: f32[1,1], index: 7, kind: output, shape index: {}]  }
   0x1   :  { %13 = vsyncpa [#allocation5], 0  ;;  %s26_s26 = sshll.u32 %s1702_s4, 4  ;;  %s1520_s27 = smov [#allocation3]   ;;  %s27_s26 = int_to_ptr.hbm [resolvable:$true] %s26_s26 }
   0x2   :  { %s28_s28 = sshll.u32 %s1520_s27, 4  ;;  %s1521_s29 = smov 128   ;;  %s29_s28 = int_to_ptr.vmem [resolvable:$true] %s28_s28 }
   0x3   :  { %s1522_s30 = smov 8  }
   0x4   :  { %34 = dma.hbm_to_vmem [thread:$0]  %s27_s26, 8192, %s29_s28, [#allocation4], %s1521_s29, %s1521_s29, %s1522_s30  }
   0x5   :  { %1516 = dma.done.wait [#allocation4], 8192  }
   0x6   :  { %1517 = vsyncadd [#allocation4], 4294959104  ;;  %v1096_v0 = vld [vmem:[#allocation3 + $0x170] sm:$0xf]  ;;  %v1393_v1 = vld [vmem:[#allocation3 + $0x174] sm:$0xf0] }
   0x7   :  { %v1160_v2 = vld [vmem:[#allocation3 + $0x1f0] sm:$0xf]  ;;  %v1097_v3 = vor.u32 %v1393_v1, %v1096_v0  ;;  %v1409_v4 = vld [vmem:[#allocation3 + $0x1f4] sm:$0xf0]  ;;  %v1088_v5 = vld [vmem:[#allocation3 + $0x160] sm:$0xf] }
   0x8   :  { %v1391_v6 = vld [vmem:[#allocation3 + $0x164] sm:$0xf0]  ;;  %v1161_v7 = vor.u32 %v1409_v4, %v1160_v2  ;;  %v1152_v8 = vld [vmem:[#allocation3 + $0x1e0] sm:$0xf]  ;;  %v1080_v12 = vld [vmem:[#allocation3 + $0x150] sm:$0xf] }
   0x9   :  { %v1407_v9 = vld [vmem:[#allocation3 + $0x1e4] sm:$0xf0]  ;;  %1428 = vmatpush.bf16.msra.mxu2 %v1097_v3  ;;  %397 = vmatpush.bf16.msra.mxu0 %v1097_v3  ;;  %v1089_v10 = vor.u32 %v1391_v6, %v1088_v5  ;;  %v1389_v13 = vld [vmem:[#allocation3 + $0x154] sm:$0xf0]  ;;  %v1144_v14 = vld [vmem:[#allocation3 + $0x1d0] sm:$0xf] }
   0xa   :  { %419 = vmatpush.bf16.msra.mxu1 %v1161_v7  ;;  %v1153_v11 = vor.u32 %v1407_v9, %v1152_v8  ;;  %v1405_v15 = vld [vmem:[#allocation3 + $0x1d4] sm:$0xf0]  ;;  %v1081_v16 = vor.u32 %v1389_v13, %v1080_v12  ;;  %v1072_v17 = vld [vmem:[#allocation3 + $0x140] sm:$0xf]  ;;  %v1387_v19 = vld [vmem:[#allocation3 + $0x144] sm:$0xf0] }
   0xb   :  { %v1145_v18 = vor.u32 %v1405_v15, %v1144_v14  ;;  %v1408_v20 = vld [vmem:[#allocation3 + $0x1f4] sm:$0xf]  ;;  %v1162_v21 = vld [vmem:[#allocation3 + $0x1f8] sm:$0xf0]  ;;  %v1136_v22 = vld [vmem:[#allocation3 + $0x1c0] sm:$0xf]  ;;  %v1073_v27 = vor.u32 %v1387_v19, %v1072_v17 }
   0xc   :  { %v1403_v23 = vld [vmem:[#allocation3 + $0x1c4] sm:$0xf0]  ;;  %v1165_v24 = vor.u32 %v1408_v20, %v1162_v21  ;;  %v1406_v25 = vld [vmem:[#allocation3 + $0x1e4] sm:$0xf]  ;;  %v1154_v26 = vld [vmem:[#allocation3 + $0x1e8] sm:$0xf0] }
   0xd   :  { %1429 = vmatpush.bf16.msra.mxu2 %v1089_v10  ;;  %398 = vmatpush.bf16.msra.mxu0 %v1089_v10  ;;  %v1137_v28 = vor.u32 %v1403_v23, %v1136_v22  ;;  %v1064_v29 = vld [vmem:[#allocation3 + $0x130] sm:$0xf]  ;;  %v1385_v30 = vld [vmem:[#allocation3 + $0x134] sm:$0xf0]  ;;  %v1157_v32 = vor.u32 %v1406_v25, %v1154_v26  ;;  %v1404_v34 = vld [vmem:[#allocation3 + $0x1d4] sm:$0xf] }
   0xe   :  { %420 = vmatpush.bf16.msra.mxu1 %v1153_v11  ;;  %v1128_v31 = vld [vmem:[#allocation3 + $0x1b0] sm:$0xf]  ;;  %460 = vmatpush.bf16.msra.mxu3 %v1165_v24  ;;  %v1401_v33 = vld [vmem:[#allocation3 + $0x1b4] sm:$0xf0]  ;;  %v1146_v35 = vld [vmem:[#allocation3 + $0x1d8] sm:$0xf0]  ;;  %v1065_v36 = vor.u32 %v1385_v30, %v1064_v29 }
   0xf   :  { %v1056_v37 = vld [vmem:[#allocation3 + $0x120] sm:$0xf]  ;;  %v1383_v38 = vld [vmem:[#allocation3 + $0x124] sm:$0xf0]  ;;  %v1129_v39 = vor.u32 %v1401_v33, %v1128_v31  ;;  %v1149_v42 = vor.u32 %v1404_v34, %v1146_v35  ;;  %v147_v43 = vld [vmem:[%s1699_s1] sm:$0xf] }
  0x10   :  { %v1120_v40 = vld [vmem:[#allocation3 + $0x1a0] sm:$0xf]  ;;  %v1399_v41 = vld [vmem:[#allocation3 + $0x1a4] sm:$0xf0]  ;;  %v1402_v44 = vld [vmem:[#allocation3 + $0x1c4] sm:$0xf]  ;;  %v1057_v46 = vor.u32 %v1383_v38, %v1056_v37 }
  0x11   :  { %1430 = vmatpush.bf16.msra.mxu2 %v1081_v16  ;;  %399 = vmatpush.bf16.msra.mxu0 %v1081_v16  ;;  %v1138_v45 = vld [vmem:[#allocation3 + $0x1c8] sm:$0xf0]  ;;  %149 = vst [vmem:[#allocation1] ss:$4 sm:$0xff] %v147_v43  ;;  %v1121_v47 = vor.u32 %v1399_v41, %v1120_v40  ;;  %v1048_v48 = vld [vmem:[#allocation3 + $0x110] sm:$0xf] }
  0x12   :  { %421 = vmatpush.bf16.msra.mxu1 %v1145_v18  ;;  %461 = vmatpush.bf16.msra.mxu3 %v1157_v32  ;;  %v1381_v49 = vld [vmem:[#allocation3 + $0x114] sm:$0xf0]  ;;  %v1112_v50 = vld [vmem:[#allocation3 + $0x190] sm:$0xf]  ;;  %v1141_v51 = vor.u32 %v1402_v44, %v1138_v45  ;;  %v1400_v53 = vld [vmem:[#allocation3 + $0x1b4] sm:$0xf] }
  0x13   :  { %v1397_v52 = vld [vmem:[#allocation3 + $0x194] sm:$0xf0]  ;;  %v1130_v54 = vld [vmem:[#allocation3 + $0x1b8] sm:$0xf0]  ;;  %v1040_v55 = vld [vmem:[#allocation3 + $0x100] sm:$0xf]  ;;  %v1049_v58 = vor.u32 %v1381_v49, %v1048_v48 }
  0x14   :  { %v1379_v56 = vld [vmem:[#allocation3 + $0x104] sm:$0xf0]  ;;  %v155_v57 = vld [vmem:[%s1700_s2] sm:$0xf]  ;;  %v1104_v59 = vld [vmem:[#allocation3 + $0x180] sm:$0xf]  ;;  %v1113_v62 = vor.u32 %v1397_v52, %v1112_v50  ;;  %v1133_v1 = vor.u32 %v1400_v53, %v1130_v54 }
  0x15   :  { %1431 = vmatpush.bf16.msra.mxu2 %v1073_v27  ;;  %400 = vmatpush.bf16.msra.mxu0 %v1073_v27  ;;  %v1395_v60 = vld [vmem:[#allocation3 + $0x184] sm:$0xf0]  ;;  %v1392_v61 = vld [vmem:[#allocation3 + $0x174] sm:$0xf]  ;;  %v1098_v2 = vld [vmem:[#allocation3 + $0x178] sm:$0xf0]  ;;  %v1041_v8 = vor.u32 %v1379_v56, %v1040_v55 }
  0x16   :  { %422 = vmatpush.bf16.msra.mxu1 %v1137_v28  ;;  %462 = vmatpush.bf16.msra.mxu3 %v1149_v42  ;;  %v1398_v3 = vld [vmem:[#allocation3 + $0x1a4] sm:$0xf]  ;;  %v1422_v4 = vld [vmem:[%s1698_s0 + $0x4] sm:$0xf]  ;;  %v1122_v5 = vld [vmem:[#allocation3 + $0x1a8] sm:$0xf0]  ;;  %v1105_v12 = vor.u32 %v1395_v60, %v1104_v59  ;;  %v1101_v13 = vor.u32 %v1392_v61, %v1098_v2 }
  0x17   :  { %v1288_v6 = vld [vmem:[#allocation3 + $0xf0] sm:$0xf]  ;;  %v1377_v7 = vld [vmem:[#allocation3 + $0xf4] sm:$0xf0]  ;;  %v1018_v9 = vld [vmem:[%s1698_s0 + $0x8] sm:$0xf0]  ;;  %v1125_v19 = vor.u32 %v1398_v3, %v1122_v5 }
  0x18   :  { %v150_v63 = vld.sshfl [vmem:[#allocation1] sm:$0xff pattern:$0x73625140]  ;;  %v151_v0 = vld.sshfl [vmem:[#allocation1 + $0x8] sm:$0xff pattern:$0x73625140]  ;;  %v1289_v20 = vor.u32 %v1377_v7, %v1288_v6  ;;  %v1593_v27 = vor.u32 %v1422_v4, %v1018_v9 }
  0x19   :  { %1432 = vmatpush.bf16.msra.mxu2 %v1065_v36  ;;  %401 = vmatpush.bf16.msra.mxu0 %v1065_v36  ;;  %157 = vst [vmem:[#allocation1] ss:$4 sm:$0xff] %v155_v57  ;;  %v1016_v10 = vld [vmem:[%s1698_s0] sm:$0xf]  ;;  %v1423_v11 = vld [vmem:[%s1698_s0 + $0x4] sm:$0xf0]  ;;  %v1586_v18 = vpack.c.bf16 %v151_v0, %v150_v63 }
  0x1a   :  { %423 = vmatpush.bf16.msra.mxu1 %v1129_v39  ;;  %463 = vmatpush.bf16.msra.mxu3 %v1141_v51  ;;  %v1390_v14 = vld [vmem:[#allocation3 + $0x164] sm:$0xf]  ;;  %v1224_v15 = vld [vmem:[#allocation3 + $0x70] sm:$0xf]  ;;  %v1361_v16 = vld [vmem:[#allocation3 + $0x74] sm:$0xf0]  ;;  %v1588_v23 = vor.u32 %v1423_v11, %v1016_v10 }
  0x1b   :  { %v1090_v17 = vld [vmem:[#allocation3 + $0x168] sm:$0xf0]  ;;  %v1396_v21 = vld [vmem:[#allocation3 + $0x194] sm:$0xf]  ;;  %v1114_v22 = vld [vmem:[#allocation3 + $0x198] sm:$0xf0]  ;;  %v1225_v30 = vor.u32 %v1361_v16, %v1224_v15  ;;  %v192_v38 = vunpack.c.l.b16 %v1586_v18 }
  0x1c   :  { %v163_v24 = vld [vmem:[%s1701_s3] sm:$0xf]  ;;  %v1280_v25 = vld [vmem:[#allocation3 + $0xe0] sm:$0xf]  ;;  %v1375_v26 = vld [vmem:[#allocation3 + $0xe4] sm:$0xf0]  ;;  %v1093_v33 = vor.u32 %v1390_v14, %v1090_v17  ;;  %v1117_v36 = vor.u32 %v1396_v21, %v1114_v22 }
  0x1d   :  { %1433 = vmatpush.bf16.msra.mxu2 %v1057_v46  ;;  %402 = vmatpush.bf16.msra.mxu0 %v1057_v46  ;;  %v1388_v28 = vld [vmem:[#allocation3 + $0x154] sm:$0xf]  ;;  %v1082_v29 = vld [vmem:[#allocation3 + $0x158] sm:$0xf0]  ;;  %v1216_v31 = vld [vmem:[#allocation3 + $0x60] sm:$0xf]  ;;  %v1281_v39 = vor.u32 %v1375_v26, %v1280_v25  ;;  %v194_v52 = vpack.c.b16 %v192_v38, %v192_v38 }
  0x1e   :  { %424 = vmatpush.bf16.msra.mxu1 %v1121_v47  ;;  %464 = vmatpush.bf16.msra.mxu3 %v1133_v1  ;;  %v1359_v32 = vld [vmem:[#allocation3 + $0x64] sm:$0xf0]  ;;  %v1394_v40 = vld [vmem:[#allocation3 + $0x184] sm:$0xf]  ;;  %v1106_v41 = vld [vmem:[#allocation3 + $0x188] sm:$0xf0]  ;;  %v1085_v48 = vor.u32 %v1388_v28, %v1082_v29 }
  0x1f   :  { %v1272_v42 = vld [vmem:[#allocation3 + $0xd0] sm:$0xf]  ;;  %v1373_v43 = vld [vmem:[#allocation3 + $0xd4] sm:$0xf0]  ;;  %v1217_v45 = vor.u32 %v1359_v32, %v1216_v31  ;;  %v1376_v46 = vld [vmem:[#allocation3 + $0xf4] sm:$0xf]  ;;  %v1109_v49 = vor.u32 %v1394_v40, %v1106_v41 }
  0x20   :  { %v158_v34 = vld.sshfl [vmem:[#allocation1] sm:$0xff pattern:$0x73625140]  ;;  %v159_v35 = vld.sshfl [vmem:[#allocation1 + $0x8] sm:$0xff pattern:$0x73625140]  ;;  %v1273_v56 = vor.u32 %v1373_v43, %v1272_v42 }
  0x21   :  { %1434 = vmatpush.bf16.msra.mxu2 %v1049_v58  ;;  %403 = vmatpush.bf16.msra.mxu0 %v1049_v58  ;;  %v1595_v37 = vpack.c.bf16 %v159_v35, %v158_v34  ;;  %165 = vst [vmem:[#allocation1] ss:$4 sm:$0xff] %v163_v24  ;;  %v1290_v47 = vld [vmem:[#allocation3 + $0xf8] sm:$0xf0]  ;;  %v1208_v50 = vld [vmem:[#allocation3 + $0x50] sm:$0xf] }
  0x22   :  { %425 = vmatpush.bf16.msra.mxu1 %v1113_v62  ;;  %465 = vmatpush.bf16.msra.mxu3 %v1125_v19  ;;  %v1357_v51 = vld [vmem:[#allocation3 + $0x54] sm:$0xf0]  ;;  %v1386_v54 = vld [vmem:[#allocation3 + $0x144] sm:$0xf]  ;;  %v1074_v55 = vld [vmem:[#allocation3 + $0x148] sm:$0xf0]  ;;  %v1293_v59 = vor.u32 %v1376_v46, %v1290_v47 }
  0x23   :  { %v197_v44 = vunpack.c.l.b16 %v1595_v37  ;;  %vm203_vm0 = vcmask 1040384   ;;  %v1264_v57 = vld [vmem:[#allocation3 + $0xc0] sm:$0xf]  ;;  %v1371_v58 = vld [vmem:[#allocation3 + $0xc4] sm:$0xf0]  ;;  %v1209_v62 = vor.u32 %v1357_v51, %v1208_v50  ;;  %v1077_v1 = vor.u32 %v1386_v54, %v1074_v55  ;;  %s1523_s24 = smov 64  }
  0x24   :  { %v1384_v61 = vld [vmem:[#allocation3 + $0x134] sm:$0xf]  ;;  %v1374_v63 = vld [vmem:[#allocation3 + $0xe4] sm:$0xf]  ;;  %v1282_v0 = vld [vmem:[#allocation3 + $0xe8] sm:$0xf0]  ;;  %v1265_v7 = vor.u32 %v1371_v58, %v1264_v57  ;;  %v198_v46 = vunpack.c.h.b16 %v1595_v37  ;;  %v193_v37 = vunpack.c.h.b16 %v1586_v18 }
  0x25   :  { %1435 = vmatpush.bf16.msra.mxu2 %v1041_v8  ;;  %404 = vmatpush.bf16.msra.mxu0 %v1041_v8  ;;  %v199_v53 = vpack.c.b16 %v197_v44, %v197_v44  ;;  %v1066_v2 = vld [vmem:[#allocation3 + $0x138] sm:$0xf0]  ;;  %v1200_v3 = vld [vmem:[#allocation3 + $0x40] sm:$0xf]  ;;  %v1355_v4 = vld [vmem:[#allocation3 + $0x44] sm:$0xf0]  ;;  %v1285_v11 = vor.u32 %v1374_v63, %v1282_v0 }
  0x26   :  { %426 = vmatpush.bf16.msra.mxu1 %v1105_v12  ;;  %466 = vmatpush.bf16.msra.mxu3 %v1117_v36  ;;  %v1024_v6 = vld [vmem:[%s1698_s0 + $0x10] sm:$0xf]  ;;  %v1256_v8 = vld [vmem:[#allocation3 + $0xb0] sm:$0xf]  ;;  %v1369_v9 = vld [vmem:[#allocation3 + $0xb4] sm:$0xf0]  ;;  %v1069_v16 = vor.u32 %v1384_v61, %v1066_v2 }
  0x27   :  { %v201_v60 = vrot.slane %v199_v53, 7  ;;  %v1424_v10 = vld [vmem:[%s1698_s0 + $0x14] sm:$0xf]  ;;  %v1425_v12 = vld [vmem:[%s1698_s0 + $0x14] sm:$0xf0]  ;;  %v1257_v24 = vor.u32 %v1369_v9, %v1256_v8  ;;  %v195_v9 = vpack.c.b16 %v193_v37, %v193_v37  ;;  %vm799_vm1 = vcmask 523264  }
  0x28   :  { %405 = vmatmul.bf16.vlgmr.msra.gmra.mxu0 %v1588_v23  ;;  %v1372_v14 = vld [vmem:[#allocation3 + $0xd4] sm:$0xf]  ;;  %v1274_v15 = vld [vmem:[#allocation3 + $0xd8] sm:$0xf0]  ;;  %v1192_v19 = vld [vmem:[#allocation3 + $0x30] sm:$0xf]  ;;  %v1618_v25 = vor.u32 %v1425_v12, %v1024_v6 }
  0x29   :  { %441 = vmatpush.bf16.msrb.mxu2 %v1101_v13  ;;  %427 = vmatmul.bf16.vlgmr.msra.gmra.mxu1 %v1593_v27  ;;  %v1602_v5 = vsel %vm203_vm0, %v194_v52, %v201_v60  ;;  %v1201_v13 = vor.u32 %v1355_v4, %v1200_v3  ;;  %v1026_v17 = vld [vmem:[%s1698_s0 + $0x18] sm:$0xf0]  ;;  %v1382_v21 = vld [vmem:[#allocation3 + $0x124] sm:$0xf]  ;;  %v1058_v22 = vld [vmem:[#allocation3 + $0x128] sm:$0xf0]  ;;  %v1277_v29 = vor.u32 %v1372_v14, %v1274_v15 }
  0x2a   :  { %656 = vmatpush.bf16.msrb.mxu1 %v1289_v20  ;;  %639 = vmatpush.bf16.msrb.mxu0 %v1225_v30  ;;  %v1353_v20 = vld [vmem:[#allocation3 + $0x34] sm:$0xf0]  ;;  %v1248_v26 = vld [vmem:[#allocation3 + $0xa0] sm:$0xf]  ;;  %v1367_v28 = vld [vmem:[#allocation3 + $0xa4] sm:$0xf0]  ;;  %v1029_v30 = vor.u32 %v1424_v10, %v1026_v17  ;;  %v1061_v32 = vor.u32 %v1382_v21, %v1058_v22 }
  0x2b   :  { %467 = vmatpush.bf16.msra.mxu3 %v1109_v49  ;;  %415 = vmatmul.bf16.vlgmr.msra.gmra.mxu2 %v1602_v5  ;;  %v1193_v31 = vor.u32 %v1353_v20, %v1192_v19  ;;  %v1184_v34 = vld [vmem:[#allocation3 + $0x20] sm:$0xf]  ;;  %v1050_v35 = vld [vmem:[#allocation3 + $0x118] sm:$0xf0]  ;;  %v1249_v36 = vor.u32 %v1367_v28, %v1248_v26  ;;  %v1370_v38 = vld [vmem:[#allocation3 + $0xc4] sm:$0xf] }
  0x2c   :  { %v1240_v40 = vld [vmem:[#allocation3 + $0x90] sm:$0xf]  ;;  %v1365_v41 = vld [vmem:[#allocation3 + $0x94] sm:$0xf0]  ;;  %v1368_v44 = vld [vmem:[#allocation3 + $0xb4] sm:$0xf] }
  0x2d   :  { %442 = vmatpush.bf16.msrb.mxu2 %v1093_v33  ;;  %v1380_v33 = vld [vmem:[#allocation3 + $0x114] sm:$0xf]  ;;  %v1176_v47 = vld [vmem:[#allocation3 + $0x10] sm:$0xf]  ;;  %v1258_v49 = vld [vmem:[#allocation3 + $0xb8] sm:$0xf0]  ;;  %v1241_v53 = vor.u32 %v1365_v41, %v1240_v40 }
  0x2e   :  { %657 = vmatpush.bf16.msrb.mxu1 %v1281_v39  ;;  %640 = vmatpush.bf16.msrb.mxu0 %v1217_v45  ;;  %v1266_v39 = vld [vmem:[#allocation3 + $0xc8] sm:$0xf0]  ;;  %v1053_v45 = vor.u32 %v1380_v33, %v1050_v35  ;;  %v1378_v50 = vld [vmem:[#allocation3 + $0x104] sm:$0xf]  ;;  %v1360_v52 = vld [vmem:[#allocation3 + $0x74] sm:$0xf]  ;;  %v1261_v57 = vor.u32 %v1368_v44, %v1258_v49 }
  0x2f   :  { %689 = vmatpush.bf16.msrb.mxu3 %v1293_v59  ;;  %v1269_v42 = vor.u32 %v1370_v38, %v1266_v39  ;;  %v1042_v51 = vld [vmem:[#allocation3 + $0x108] sm:$0xf0]  ;;  %v1226_v54 = vld [vmem:[#allocation3 + $0x78] sm:$0xf0]  ;;  %v1232_v55 = vld [vmem:[#allocation3 + $0x80] sm:$0xf] }
  0x30   :  { %468 = vmatmul.bf16.vlgmr.msra.gmra.mxu3 %v1593_v27  ;;  %v1351_v27 = vld [vmem:[#allocation3 + $0x24] sm:$0xf0]  ;;  %v1366_v59 = vld [vmem:[#allocation3 + $0xa4] sm:$0xf]  ;;  %v1250_v60 = vld [vmem:[#allocation3 + $0xa8] sm:$0xf0]  ;;  %v1045_v61 = vor.u32 %v1378_v50, %v1042_v51 }
  0x31   :  { %443 = vmatpush.bf16.msrb.mxu2 %v1085_v48  ;;  %v1185_v43 = vor.u32 %v1351_v27, %v1184_v34  ;;  %v1349_v48 = vld [vmem:[#allocation3 + $0x14] sm:$0xf0]  ;;  %v1168_v63 = vld [vmem:[#allocation3] sm:$0xf]  ;;  %v1347_v0 = vld [vmem:[#allocation3 + $0x4] sm:$0xf0]  ;;  %v1253_v6 = vor.u32 %v1366_v59, %v1250_v60 }
  0x32   :  { %658 = vmatpush.bf16.msrb.mxu1 %v1273_v56  ;;  %641 = vmatpush.bf16.msrb.mxu0 %v1209_v62  ;;  %v1363_v56 = vld [vmem:[#allocation3 + $0x84] sm:$0xf0]  ;;  %v1177_v58 = vor.u32 %v1349_v48, %v1176_v47  ;;  %v200_v62 = vpack.c.b16 %v198_v46, %v198_v46  ;;  %v1358_v3 = vld [vmem:[#allocation3 + $0x64] sm:$0xf]  ;;  %v1218_v4 = vld [vmem:[#allocation3 + $0x68] sm:$0xf0] }
  0x33   :  { %690 = vmatpush.bf16.msrb.mxu3 %v1285_v11  ;;  %v1233_v2 = vor.u32 %v1363_v56, %v1232_v55  ;;  %v1032_v8 = vld [vmem:[%s1698_s0 + $0x20] sm:$0xf]  ;;  %v1427_v18 = vld [vmem:[%s1698_s0 + $0x24] sm:$0xf0]  ;;  %v1221_v11 = vor.u32 %v1358_v3, %v1218_v4  ;;  %v1356_v12 = vld [vmem:[#allocation3 + $0x54] sm:$0xf] }
  0x34   :  { %v202_v10 = vrot.slane %v200_v62, 7  ;;  %v1033_v14 = vor.u32 %v1427_v18, %v1032_v8  ;;  %v1364_v15 = vld [vmem:[#allocation3 + $0x94] sm:$0xf]  ;;  %v1362_v20 = vld [vmem:[#allocation3 + $0x84] sm:$0xf]  ;;  %v1414_v60 = vld [vmem:[%s1703_s5 + $0x20] sm:$0xff] }
  0x35   :  { %444 = vmatpush.bf16.msrb.mxu2 %v1077_v1  ;;  %v1229_v1 = vor.u32 %v1360_v52, %v1226_v54  ;;  %v1234_v21 = vld [vmem:[#allocation3 + $0x88] sm:$0xf0]  ;;  %v1426_v34 = vld [vmem:[%s1698_s0 + $0x24] sm:$0xf]  ;;  %v1034_v27 = vld [vmem:[%s1698_s0 + $0x28] sm:$0xf0] }
  0x36   :  { %659 = vmatpush.bf16.msrb.mxu1 %v1265_v7  ;;  %642 = vmatpush.bf16.msrb.mxu0 %v1201_v13  ;;  %v1169_v7 = vor.u32 %v1347_v0, %v1168_v63  ;;  %v1210_v13 = vld [vmem:[#allocation3 + $0x58] sm:$0xf0]  ;;  %v210_v17 = vsel %vm203_vm0, %v195_v9, %v202_v10  ;;  %v1202_v26 = vld [vmem:[#allocation3 + $0x48] sm:$0xf0]  ;;  %v1237_v28 = vor.u32 %v1362_v20, %v1234_v21  ;;  %v1346_v44 = vld [vmem:[#allocation3 + $0x4] sm:$0xf] }
  0x37   :  { %691 = vmatpush.bf16.msrb.mxu3 %v1277_v29  ;;  %v1213_v22 = vor.u32 %v1356_v12, %v1210_v13  ;;  %v1186_v33 = vld [vmem:[#allocation3 + $0x28] sm:$0xf0]  ;;  %v1178_v38 = vld [vmem:[#allocation3 + $0x18] sm:$0xf0]  ;;  %v1037_v39 = vor.u32 %v1426_v34, %v1034_v27  ;;  %v1417_v56 = vld [vmem:[%s1703_s5 + $0x38] sm:$0xff]  ;;  %vm961_vm2 = vcmask 257024  }
  0x38   :  { %410 = vmatmul.bf16.gmra.mxu0 %v1618_v25  ;;  %v166_v40 = vld.sshfl [vmem:[#allocation1] sm:$0xff pattern:$0x73625140]  ;;  %v167_v41 = vld.sshfl [vmem:[#allocation1 + $0x8] sm:$0xff pattern:$0x73625140] }
  0x39   :  { %445 = vmatpush.bf16.msrb.mxu2 %v1069_v16  ;;  %432 = vmatmul.bf16.gmra.mxu1 %v1029_v30  ;;  %v1242_v16 = vld [vmem:[#allocation3 + $0x98] sm:$0xf0]  ;;  %v1415_v59 = vld [vmem:[%s1703_s5 + $0x28] sm:$0xff]  ;;  %v1413_v0 = vld [vmem:[%s1703_s5 + $0x18] sm:$0xff]  ;;  %vm891_vm4 = vcmask 7168   ;;  %vm979_vm5 = vcmask 3072  }
  0x3a   :  { %660 = vmatpush.bf16.msrb.mxu1 %v1257_v24  ;;  %643 = vmatpush.bf16.msrb.mxu0 %v1193_v31  ;;  %v1245_v19 = vor.u32 %v1364_v15, %v1242_v16  ;;  %v1354_v24 = vld [vmem:[#allocation3 + $0x44] sm:$0xf]  ;;  %v1410_v8 = vld [vmem:[%s1703_s5] sm:$0xff]  ;;  %s1004_s2 = sshll.u32 %s1705_s7, 4  ;;  %s1524_s15 = smov [#allocation6]   ;;  %vm995_vm6 = vcmask 0   ;;  %s1005_s2 = int_to_ptr.hbm [resolvable:$true] %s1004_s2 }
  0x3b   :  { %692 = vmatpush.bf16.msrb.mxu3 %v1269_v42  ;;  %v1205_v29 = vor.u32 %v1354_v24, %v1202_v26  ;;  %v170_v42 = vpack.c.bf16 %v167_v41, %v166_v40  ;;  %s1002_s16 = sshll.u32 %s1524_s15, 4  ;;  %s1003_s16 = int_to_ptr.vmem [resolvable:$true] %s1002_s16 }
  0x3d   :  { %446 = vmatpush.bf16.msrb.mxu2 %v1061_v32  ;;  %v1350_v32 = vld [vmem:[#allocation3 + $0x24] sm:$0xf]  ;;  %v223_v46 = vunpack.c.l.b16 %v170_v42  ;;  %v224_v49 = vunpack.c.h.b16 %v170_v42 }
  0x3e   :  { %661 = vmatpush.bf16.msrb.mxu1 %v1249_v36  ;;  %644 = vmatpush.bf16.msrb.mxu0 %v1185_v43  ;;  %v1189_v35 = vor.u32 %v1350_v32, %v1186_v33  ;;  %v1348_v36 = vld [vmem:[#allocation3 + $0x14] sm:$0xf] }
  0x3f   :  { %693 = vmatpush.bf16.msrb.mxu3 %v1261_v57  ;;  %v1181_v43 = vor.u32 %v1348_v36, %v1178_v38  ;;  %v225_v47 = vpack.c.b16 %v223_v46, %v223_v46  ;;  %v1416_v57 = vld [vmem:[%s1703_s5 + $0x30] sm:$0xff] }
  0x40   :  { %471 = vmatmul.bf16.gmra.mxu3 %v1029_v30  ;;  %v1352_v30 = vld [vmem:[#allocation3 + $0x34] sm:$0xf] }
  0x41   :  { %447 = vmatpush.bf16.msrb.mxu2 %v1053_v45  ;;  %v1170_v45 = vld [vmem:[#allocation3 + $0x8] sm:$0xf0]  ;;  %v227_v50 = vrot.slane %v225_v47, 7 }
  0x42   :  { %662 = vmatpush.bf16.msrb.mxu1 %v1241_v53  ;;  %645 = vmatpush.bf16.msrb.mxu0 %v1177_v58  ;;  %v1173_v48 = vor.u32 %v1346_v44, %v1170_v45 }
  0x43   :  { %694 = vmatpush.bf16.msrb.mxu3 %v1253_v6  ;;  %v231_v51 = vsel %vm203_vm0, %v225_v47, %v227_v50  ;;  %v1411_v6 = vld [vmem:[%s1703_s5 + $0x8] sm:$0xff] }
  0x45   :  { %448 = vmatpush.bf16.msrb.mxu2 %v1045_v61 }
  0x46   :  { %663 = vmatpush.bf16.msrb.mxu1 %v1233_v2  ;;  %646 = vmatpush.bf16.msrb.mxu0 %v1169_v7  ;;  %v1412_v2 = vld [vmem:[%s1703_s5 + $0x10] sm:$0xff] }
  0x47   :  { %695 = vmatpush.bf16.msrb.mxu3 %v1245_v19 }
  0x48   :  { %449 = vmatmul.bf16.vlgmr.msrb.gmra.mxu2 %v1588_v23  ;;  %v1194_v23 = vld [vmem:[#allocation3 + $0x38] sm:$0xf0] }
  0x49   :  { %673 = vmatpush.bf16.msra.mxu2 %v1229_v1  ;;  %647 = vmatmul.bf16.vlgmr.msrb.gmra.mxu0 %v1033_v14  ;;  %v1197_v31 = vor.u32 %v1352_v30, %v1194_v23 }
  0x4a   :  { %437 = vmatmul.bf16.gmra.mxu1 %v210_v17  ;;  %766 = vmatpush.bf16.msra.mxu0 %v1417_v56 }
  0x4b   :  { %696 = vmatpush.bf16.msrb.mxu3 %v1237_v28 }
  0x4d   :  { %674 = vmatpush.bf16.msra.mxu2 %v1221_v11 }
  0x4e   :  { %767 = vmatpush.bf16.msra.mxu0 %v1416_v57 }
  0x50   :  { %474 = vmatmul.bf16.gmra.mxu3 %v210_v17 }
  0x51   :  { %675 = vmatpush.bf16.msra.mxu2 %v1213_v22 }
  0x52   :  { %768 = vmatpush.bf16.msra.mxu0 %v1415_v59 }
  0x55   :  { %676 = vmatpush.bf16.msra.mxu2 %v1205_v29 }
  0x56   :  { %769 = vmatpush.bf16.msra.mxu0 %v1414_v60 }
  0x58   :  { %452 = vmatmul.bf16.gmra.mxu2 %v1618_v25  ;;  %v226_v25 = vpack.c.b16 %v224_v49, %v224_v49 }
  0x59   :  { %677 = vmatpush.bf16.msra.mxu2 %v1197_v31  ;;  %652 = vmatmul.bf16.gmra.mxu0 %v231_v51 }
  0x5a   :  { %664 = vmatmul.bf16.vlgmr.msrb.gmra.mxu1 %v1037_v39  ;;  %v228_v52 = vrot.slane %v226_v25, 7  ;;  %770 = vmatpush.bf16.msra.mxu0 %v1413_v0 }
  0x5c   :  { %v235_v53 = vsel %vm203_vm0, %v226_v25, %v228_v52 }
  0x5d   :  { %678 = vmatpush.bf16.msra.mxu2 %v1189_v35 }
  0x5e   :  { %771 = vmatpush.bf16.msra.mxu0 %v1412_v2 }
  0x60   :  { %697 = vmatmul.bf16.vlgmr.msrb.gmra.mxu3 %v1037_v39 }
  0x61   :  { %679 = vmatpush.bf16.msra.mxu2 %v1181_v43 }
  0x62   :  { %772 = vmatpush.bf16.msra.mxu0 %v1411_v6 }
  0x65   :  { %680 = vmatpush.bf16.msra.mxu2 %v1173_v48 }
  0x66   :  { %773 = vmatpush.bf16.msra.mxu0 %v1410_v8 }
  0x68   :  { %455 = vmatmul.bf16.gmra.mxu2 %v1602_v5 }
  0x6a   :  { %669 = vmatmul.bf16.gmra.mxu1 %v235_v53 }
  0x70   :  { %700 = vmatmul.bf16.gmra.mxu3 %v235_v53 }
  0x78   :  { %681 = vmatmul.bf16.vlgmr.msra.gmra.mxu2 %v1033_v14 }
  0x88   :  { %684 = vmatmul.bf16.gmra.mxu2 %v231_v51 }
  0xa5   :  { %v406_v54 = vpop.f32.mrf.mxu0 }
  0xa6   :  { %v428_v55 = vpop.f32.mrf.mxu1 }
  0xa7   :  { %v429_v22 = vadd.f32 %v428_v55, %v406_v54 }
  0xad   :  { %v408_v5 = vpop.f32.mrf.mxu0 }
  0xae   :  { %v430_v58 = vpop.f32.mrf.mxu1  ;;  %v416_v61 = vpop.f32.mrf.mxu2 }
  0xaf   :  { %v431_v28 = vadd.f32 %v430_v58, %v408_v5  ;;  %v1445_v5 = vld [vmem:[%s1704_s6] ss:$0 sm:$0xff] }
  0xb3   :  { %v469_v37 = vpop.f32.mrf.mxu3 }
  0xb5   :  { %v411_v63 = vpop.f32.mrf.mxu0 }
  0xb6   :  { %v433_v62 = vpop.f32.mrf.mxu1  ;;  %v417_v1 = vpop.f32.mrf.mxu2 }
  0xb7   :  { %v434_v40 = vadd.f32 %v433_v62, %v411_v63 }
  0xbb   :  { %v470_v3 = vpop.f32.mrf.mxu3 }
  0xbd   :  { %v413_v7 = vpop.f32.mrf.mxu0 }
  0xbe   :  { %v435_v4 = vpop.f32.mrf.mxu1 }
  0xbf   :  { %v436_v39 = vadd.f32 %v435_v4, %v413_v7 }
  0xc3   :  { %v472_v18 = vpop.f32.mrf.mxu3 }
  0xc6   :  { %v648_v11 = vpop.f32.mrf.mxu0 }
  0xc7   :  { %v438_v9 = vpop.f32.mrf.mxu1 }
  0xcb   :  { %v450_v10 = vpop.f32.mrf.mxu2  ;;  %v473_v12 = vpop.f32.mrf.mxu3 }
  0xce   :  { %v650_v15 = vpop.f32.mrf.mxu0 }
  0xcf   :  { %v439_v13 = vpop.f32.mrf.mxu1 }
  0xd0   :  { %v1421_v13 = vld [vmem:[%s1703_s5 + $0x58] sm:$0xff] }
  0xd1   :  { %949 = vmatpush.bf16.msra.mxu1 %v1421_v13 }
  0xd3   :  { %v451_v14 = vpop.f32.mrf.mxu2  ;;  %v475_v16 = vpop.f32.mrf.mxu3 }
  0xd4   :  { %v1420_v14 = vld [vmem:[%s1703_s5 + $0x50] sm:$0xff] }
  0xd5   :  { %950 = vmatpush.bf16.msra.mxu1 %v1420_v14 }
  0xd6   :  { %v653_v21 = vpop.f32.mrf.mxu0 }
  0xd7   :  { %v665_v17 = vpop.f32.mrf.mxu1 }
  0xd8   :  { %v666_v20 = vadd.f32 %v665_v17, %v648_v11 }
  0xda   :  { %v705_v29 = vadd.f32 %v666_v20, %v429_v22  ;;  %v707_v44 = vadd.f32 %v666_v20, %v434_v40 }
  0xdb   :  { %v453_v19 = vpop.f32.mrf.mxu2  ;;  %v477_v24 = vpop.f32.mrf.mxu3 }
  0xdc   :  { %v709_v32 = vmax.f32 %v705_v29, 0.0  ;;  %v711_v47 = vmax.f32 %v707_v44, 0.0  ;;  %v1446_v19 = vld [vmem:[%s1704_s6 + $0x1] ss:$0 sm:$0xff] }
  0xde   :  { %v654_v34 = vpop.f32.mrf.mxu0 }
  0xdf   :  { %v667_v26 = vpop.f32.mrf.mxu1 }
  0xe0   :  { %v668_v30 = vadd.f32 %v667_v26, %v650_v15  ;;  %v1419_v15 = vld [vmem:[%s1703_s5 + $0x48] sm:$0xff] }
  0xe1   :  { %951 = vmatpush.bf16.msra.mxu1 %v1419_v15 }
  0xe2   :  { %v706_v31 = vadd.f32 %v668_v30, %v431_v28  ;;  %v708_v41 = vadd.f32 %v668_v30, %v436_v39 }
  0xe3   :  { %v454_v23 = vpop.f32.mrf.mxu2  ;;  %v698_v35 = vpop.f32.mrf.mxu3 }
  0xe4   :  { %v710_v33 = vmax.f32 %v706_v31, 0.0  ;;  %v712_v46 = vmax.f32 %v708_v41, 0.0 }
  0xe6   :  { %v715_v27 = vpack.c.bf16 %v710_v33, %v709_v32  ;;  %v716_v48 = vpack.c.bf16 %v712_v46, %v711_v47 }
  0xe7   :  { %v670_v36 = vpop.f32.mrf.mxu1 }
  0xe8   :  { %774 = vmatmul.bf16.vlgmr.msra.gmra.mxu0 %v715_v27 }
  0xeb   :  { %v456_v38 = vpop.f32.mrf.mxu2  ;;  %v699_v42 = vpop.f32.mrf.mxu3 }
  0xec   :  { %v476_v53 = vadd.f32 %v475_v16, %v456_v38  ;;  %v1418_v16 = vld [vmem:[%s1703_s5 + $0x40] sm:$0xff]  ;;  %v816_v42 = vlaneseq }
  0xed   :  { %952 = vmatpush.bf16.msra.mxu1 %v1418_v16 }
  0xee   :  { %v817_v46 = vshrl.u32 %v816_v42, 7 }
  0xef   :  { %v671_v43 = vpop.f32.mrf.mxu1 }
  0xf0   :  { %vm967_vm3 = vcmp.lt.s32.totalorder %v817_v46, 2 }
  0xf3   :  { %v458_v45 = vpop.f32.mrf.mxu2  ;;  %v701_v49 = vpop.f32.mrf.mxu3 }
  0xf4   :  { %v1447_v45 = vld [vmem:[%s1704_s6 + $0x2] ss:$0 sm:$0xff] }
  0xf8   :  { %779 = vmatmul.bf16.gmra.mxu0 %v716_v48 }
  0xfb   :  { %v682_v50 = vpop.f32.mrf.mxu2  ;;  %v703_v51 = vpop.f32.mrf.mxu3 }
 0x103   :  { %v683_v25 = vpop.f32.mrf.mxu2 }
 0x10b   :  { %v685_v52 = vpop.f32.mrf.mxu2 }
 0x10c   :  { %v702_v54 = vadd.f32 %v701_v49, %v685_v52 }
 0x10e   :  { %v713_v55 = vadd.f32 %v702_v54, %v476_v53 }
 0x110   :  { %v714_v56 = vmax.f32 %v713_v55, 0.0 }
 0x112   :  { %v717_v57 = vpack.c.bf16 %v714_v56, %v714_v56 }
 0x113   :  { %v687_v58 = vpop.f32.mrf.mxu2 }
 0x114   :  { %784 = vmatmul.bf16.gmra.mxu0 %v717_v57 }
 0x165   :  { %v775_v59 = vpop.f32.mrf.mxu0 }
 0x166   :  { %v789_v60 = vmax.f32 %v775_v59, 0.0 }
 0x168   :  { %v795_v61 = vmul.f32 %v1445_v5, %v789_v60 }
 0x16a   :  { %v800_v12 = vsel %vm799_vm1, %v795_v61, 0.0 }
 0x16d   :  { %v777_v37 = vpop.f32.mrf.mxu0 }
 0x16e   :  { %v790_v62 = vmax.f32 %v777_v37, 0.0 }
 0x170   :  { %v796_v63 = vmul.f32 %v1445_v5, %v790_v62 }
 0x172   :  { %v803_v0 = vsel %vm799_vm1, %v796_v63, 0.0 }
 0x173   :  { %804 = vadd.xlane.f32.xlu1 %v803_v0 }
 0x175   :  { %v780_v1 = vpop.f32.mrf.mxu0 }
 0x176   :  { %v791_v2 = vmax.f32 %v780_v1, 0.0 }
 0x178   :  { %v797_v3 = vmul.f32 %v1445_v5, %v791_v2 }
 0x17a   :  { %v806_v4 = vsel %vm799_vm1, %v797_v3, 0.0 }
 0x17b   :  { %807 = vadd.xlane.f32.xlu1 %v806_v4 }
 0x17d   :  { %v782_v6 = vpop.f32.mrf.mxu0 }
 0x17e   :  { %v792_v7 = vmax.f32 %v782_v6, 0.0 }
 0x180   :  { %v798_v8 = vmul.f32 %v1445_v5, %v792_v7 }
 0x182   :  { %v809_v28 = vsel %vm799_vm1, %v798_v8, 0.0 }
 0x191   :  { %v785_v18 = vpop.f32.mrf.mxu0 }
 0x192   :  { %v793_v9 = vmax.f32 %v785_v18, 0.0 }
 0x194   :  { %v914_v10 = vpack.c.bf16 %v793_v9, %v793_v9 }
 0x196   :  { %916 = vrot.lane.b32.xlu0 %v914_v10, %s1523_s24 }
 0x199   :  { %v787_v11 = vpop.f32.mrf.mxu0 }
 0x1c0   :  { %801 = vadd.xlane.f32.xlu0 %v800_v12 }
 0x1e6   :  { %v805_v30 = vpop.xlane.xlu1 %804 }
 0x1e7   :  { %v813_v31 = vmax.f32 %v805_v30, 0.0 }
 0x1e9   :  { %v833_v33 = vsub.f32 0.0, %v813_v31 }
 0x1eb   :  { %v856_v35 = vand.u32 2147483647, %v833_v33  ;;  %v852_v9 = vmax.f32 %v833_v33, 0.0 }
 0x1ed   :  { %v860_v39 = vsub.f32 0.0, %v856_v35 }
 0x1ee   :  { %v808_v34 = vpop.xlane.xlu1 %807 }
 0x1ef   :  { %v814_v36 = vmax.f32 %v808_v34, 0.0  ;;  %v865_v43 = vmul.f32 1.442695, %v860_v39 }
 0x1f1   :  { %v857_v40 = vand.u32 2147483647, %v814_v36  ;;  %v853_v16 = vmax.f32 %v814_v36, 0.0 }
 0x1f3   :  { %v861_v44 = vsub.f32 0.0, %v857_v40 }
 0x1f5   :  { %v867_v48 = vmul.f32 1.442695, %v861_v44 }
 0x208   :  { %v917_v17 = vpop.permute.xlu0 %916 }
 0x209   :  { %1345 = vmatmul.msk.bf16.vlgmr.msra.gmra.mxu1 %vm799_vm1, %v917_v17 }
 0x233   :  { %v802_v29 = vpop.xlane.xlu0 %801 }
 0x234   :  { %v812_v23 = vmax.f32 %v802_v29, 0.0 }
 0x236   :  { %v832_v32 = vsub.f32 0.0, %v812_v23 }
 0x238   :  { %v855_v27 = vand.u32 2147483647, %v832_v32  ;;  %v851_v7 = vmax.f32 %v832_v32, 0.0 }
 0x23a   :  { %v859_v38 = vsub.f32 0.0, %v855_v27 }
 0x23c   :  { %v863_v41 = vmul.f32 1.442695, %v859_v38 }
 0x23e   :  { %1448 = vpow2.f32 %v863_v41 }
 0x23f   :  { %1450 = vpow2.f32 %v865_v43 }
 0x240   :  { %1452 = vpow2.f32 %v867_v48 }
 0x244   :  { %v1449_v51 = vpop.eup %1448 }
 0x245   :  { %v1451_v53 = vpop.eup %1450  ;;  %v871_v54 = vadd.f32 1.0, %v1449_v51 }
 0x246   :  { %v872_v58 = vadd.f32 1.0, %v1451_v53  ;;  %v1453_v59 = vpop.eup %1452 }
 0x247   :  { %1454 = vlog2.f32 %v871_v54  ;;  %v873_v37 = vadd.f32 1.0, %v1453_v59 }
 0x24d   :  { %v1455_v63 = vpop.eup %1454 }
 0x24e   :  { %v876_v3 = vmul.f32 0.6931472, %v1455_v63 }
 0x250   :  { %v883_v10 = vadd.f32 %v876_v3, %v851_v7 }
 0x252   :  { %v892_v17 = vsel %vm891_vm4, %v883_v10, 0.0 }
 0x286   :  { %v954_v20 = vpop.f32.mrf.mxu1 }
 0x287   :  { %v958_v21 = vmax.f32 %v954_v20, 0.0 }
 0x289   :  { %v960_v22 = vmul.f32 %v1446_v19, %v958_v21 }
 0x28b   :  { %v962_v24 = vsel %vm961_vm2, %v960_v22, 0.0 }
 0x28c   :  { %963 = vadd.xlane.f32.xlu2 %v962_v24 }
 0x28e   :  { %v956_v26 = vpop.f32.mrf.mxu1 }
 0x294   :  { %810 = vadd.xlane.f32.xlu2 %v809_v28 }
 0x2ff   :  { %v964_v47 = vpop.xlane.xlu2 %963 }
 0x300   :  { %v966_v49 = vadd.f32 %v1447_v45, %v964_v47 }
 0x302   :  { %v968_v50 = vsub.f32 0.0, %v966_v49 }
 0x304   :  { %v969_v25 = vsel %vm967_vm3, %v968_v50, %v966_v49 }
 0x305   :  { %v971_v52 = vand.u32 2147483647, %v969_v25  ;;  %v970_v14 = vmax.f32 %v969_v25, 0.0 }
 0x307   :  { %v972_v55 = vsub.f32 0.0, %v971_v52  ;;  %v811_v56 = vpop.xlane.xlu2 %810 }
 0x308   :  { %v815_v57 = vmax.f32 %v811_v56, 0.0 }
 0x309   :  { %v973_v5 = vmul.f32 1.442695, %v972_v55 }
 0x30a   :  { %v858_v60 = vand.u32 2147483647, %v815_v57  ;;  %v854_v28 = vmax.f32 %v815_v57, 0.0 }
 0x30b   :  { %1456 = vpow2.f32 %v973_v5 }
 0x30c   :  { %v862_v61 = vsub.f32 0.0, %v858_v60  ;;  %1458 = vlog2.f32 %v872_v58 }
 0x30e   :  { %v869_v62 = vmul.f32 1.442695, %v862_v61 }
 0x310   :  { %1460 = vpow2.f32 %v869_v62 }
 0x311   :  { %v1457_v0 = vpop.eup %1456  ;;  %1462 = vlog2.f32 %v873_v37 }
 0x312   :  { %v975_v1 = vadd.f32 1.0, %v1457_v0  ;;  %v1459_v2 = vpop.eup %1458 }
 0x313   :  { %v878_v6 = vmul.f32 0.6931472, %v1459_v2 }
 0x314   :  { %1464 = vlog2.f32 %v975_v1 }
 0x315   :  { %v884_v12 = vadd.f32 %v878_v6, %v852_v9 }
 0x316   :  { %v1461_v4 = vpop.eup %1460 }
 0x317   :  { %v1463_v8 = vpop.eup %1462  ;;  %v874_v18 = vadd.f32 1.0, %v1461_v4  ;;  %v893_v21 = vsel %vm891_vm4, %v884_v12, 0.0 }
 0x318   :  { %v880_v13 = vmul.f32 0.6931472, %v1463_v8  ;;  %v894_v26 = vadd.f32 %v893_v21, %v892_v17 }
 0x319   :  { %1466 = vlog2.f32 %v874_v18 }
 0x31a   :  { %v1465_v11 = vpop.eup %1464  ;;  %v885_v20 = vadd.f32 %v880_v13, %v853_v16 }
 0x31b   :  { %v977_v15 = vmul.f32 0.6931472, %v1465_v11 }
 0x31c   :  { %v895_v23 = vsel %vm891_vm4, %v885_v20, 0.0 }
 0x31d   :  { %v978_v19 = vadd.f32 %v977_v15, %v970_v14  ;;  %v896_v31 = vadd.f32 %v895_v23, %v894_v26 }
 0x31f   :  { %v1467_v22 = vpop.eup %1466  ;;  %v980_v24 = vsel %vm979_vm5, %v978_v19, 0.0 }
 0x320   :  { %981 = vadd.xlane.f32.xlu2 %v980_v24  ;;  %v882_v29 = vmul.f32 0.6931472, %v1467_v22 }
 0x322   :  { %v886_v30 = vadd.f32 %v882_v29, %v854_v28 }
 0x324   :  { %v897_v32 = vsel %vm891_vm4, %v886_v30, 0.0 }
 0x325   :  { %v898_v33 = vadd.f32 %v897_v32, %v896_v31 }
 0x327   :  { %899 = vadd.xlane.f32.xlu1 %v898_v33 }
 0x393   :  { %v982_v34 = vpop.xlane.xlu2 %981 }
 0x394   :  { %v983_v27 = vrot.slane %v982_v34, 4 }
 0x396   :  { %v984_v35 = vadd.f32 %v983_v27, %v982_v34 }
 0x398   :  { %v985_v36 = vrot.slane %v984_v35, 2 }
 0x39a   :  { %v900_v38 = vpop.xlane.xlu1 %899  ;;  %v986_v41 = vadd.f32 %v985_v36, %v984_v35 }
 0x39b   :  { %v901_v39 = vrot.slane %v900_v38, 4 }
 0x39c   :  { %v987_v44 = vrot.slane %v986_v41, 1 }
 0x39d   :  { %v902_v40 = vadd.f32 %v901_v39, %v900_v38 }
 0x39e   :  { %v988_v47 = vadd.f32 %v987_v44, %v986_v41 }
 0x39f   :  { %v903_v42 = vrot.slane %v902_v40, 2 }
 0x3a1   :  { %v904_v43 = vadd.f32 %v903_v42, %v902_v40 }
 0x3a3   :  { %v905_v45 = vrot.slane %v904_v43, 1 }
 0x3a5   :  { %v906_v46 = vadd.f32 %v905_v45, %v904_v43 }
 0x3a7   :  { %1436 = vpush %v906_v46 }
 0x3a8   :  { %1438 = vpush %v988_v47 }
 0x3d8   :  { %s1437_s6 = spop %1436 }
 0x3d9   :  { %s991_s12 = smul.f32 0.03125, %s1437_s6  ;;  %s1439_s13 = spop %1438 }
 0x3da   :  { %s992_s14 = smul.f32 0.25, %s1439_s13 }
 0x3dc   :  { %s993_s17 = sadd.f32 %s992_s14, %s991_s12 }
 0x3de   :  { %v994_v48 = vstv %s993_s17 }
 0x3df   :  { %996 = vst.msk [vmem:[#allocation6] sm:$0x1] %vm995_vm6, %v994_v48 }
 0x3e0   :  { %1007 = dma.vmem_to_hbm [thread:$0]  %s1003_s16, 16, %s1005_s2, [#allocation5]  }
 0x3e1   :  { %1518 = dma.done.wait [#allocation5], 16  }
 0x3e2   :  { %1519 = vsyncadd [#allocation5], 4294967280 }
 0x3e3   :  { %1012 = vsyncpa [#allocation4], 1 }
 0x3e4   :  { %1013 = vsyncpa [#allocation5], 1 }

</bundles_post_ra>
